<compile_context>
chip_gen: v5e
topology: v5e:2x2
jax: 0.10.0
libtpu: 0.0.40
codegen_flags: <defaults>
</compile_context>

<pallas_src>
import functools

import jax
import jax.numpy as jnp
from jax.experimental import pallas as pl
from jax.experimental.pallas import tpu as pltpu


COUT_PAD = 16     # conv-output channels padded 9 -> 16 (sublane axis)
K_PAD = 32        # 3*3*Cin (=27) + 1 bias row, padded to bf16 sublane multiple
TGT_ROWS = 8      # [gt_density, seg, seg_sec, fore, fore_sec, pad, pad, pad]

# Kernel output-channel order (class-0 logits of the 4 heads are contiguous,
# then class-1 logits) -> the CE math uses contiguous sublane slices.
#   kernel row r holds PyTorch channel KERNEL_PERM[r].
KERNEL_PERM = (0, 1, 3, 5, 7, 2, 4, 6, 8)
# Inverse: kernel rows in PyTorch channel order.
PRED_PERM = (0, 1, 5, 2, 6, 3, 7, 4, 8)


def _round_up(x, m):
    return ((x + m - 1) // m) * m


# ----------------------------------------------------------------------------
# Fused kernel: conv-as-matmul (MXU) + MSE + 4x two-class CE on the live tile.
# ----------------------------------------------------------------------------
def _fused_conv_loss_kernel(w_ref, x_ref, t_ref, o_ref, loss_ref, acc_ref,
                            *, m_true, tile_m, inner_steps):
    c = pl.program_id(0)          # per-core ("parallel") axis
    i = pl.program_id(1)          # sequential pixel-tile axis

    @pl.when(i == 0)
    def _():
        acc_ref[...] = jnp.zeros_like(acc_ref)

    # Conv head: [16,32]bf16 @ [32,tile_m]bf16 -> [16,tile_m] f32 (MXU).
    out = jnp.dot(w_ref[...], x_ref[...], preferred_element_type=jnp.float32)
    o_ref[...] = out

    # ---- losses on the tile while it is still in VMEM -----------------------
    tgt = t_ref[...]                                        # [8, tile_m] f32
    lane = jax.lax.broadcasted_iota(jnp.int32, (1, tile_m), 1)
    gpix = (c * inner_steps + i) * tile_m + lane
    valid = (gpix < m_true).astype(jnp.float32)             # [1, tile_m]

    # MSE on the density channel (kernel row 0).
    d = (out[0:1, :] - tgt[0:1, :]) * valid
    acc_ref[0:1, :] = acc_ref[0:1, :] + d * d

    # 4x two-class CE, all heads batched: rows 1..4 = class-0 logits,
    # rows 5..8 = class-1 logits, target rows 1..4 = labels (0/1).
    l0 = out[1:5, :]
    l1 = out[5:9, :]
    lbl = tgt[1:5, :]
    lse = jnp.maximum(l0, l1) + jnp.log1p(jnp.exp(-jnp.abs(l0 - l1)))
    sel = jnp.where(lbl < 0.5, l0, l1)
    acc_ref[1:5, :] = acc_ref[1:5, :] + (lse - sel) * valid

    # Finalize once per core: cross-lane reduce + tiny store of raw sums.
    @pl.when(i == inner_steps - 1)
    def _():
        sums = jnp.sum(acc_ref[...], axis=1, keepdims=True)  # [8, 1]
        loss_ref[...] = sums.reshape(1, TGT_ROWS, 1)


def fused_conv_and_losses(w_mat, patchesT, tgtT, *, m_true, tile_m):
    k_pad, m_pad = patchesT.shape
    assert k_pad == K_PAD and m_pad % (2 * tile_m) == 0
    inner = m_pad // (2 * tile_m)
    grid = (2, inner)

    kernel = functools.partial(
        _fused_conv_loss_kernel,
        m_true=m_true, tile_m=tile_m, inner_steps=inner)

    cost = pl.CostEstimate(
        flops=2 * COUT_PAD * K_PAD * m_pad + 40 * m_pad,
        transcendentals=8 * m_pad,
        bytes_accessed=(K_PAD * m_pad * 2           # patches (bf16)
                        + TGT_ROWS * m_pad * 4      # targets (f32)
                        + COUT_PAD * m_pad * 4      # conv output (f32)
                        + COUT_PAD * K_PAD * 2 + 2 * TGT_ROWS * 4))

    slab, loss_rows = pl.pallas_call(
        kernel,
        out_shape=(jax.ShapeDtypeStruct((COUT_PAD, m_pad), jnp.float32),
                   jax.ShapeDtypeStruct((2, TGT_ROWS, 1), jnp.float32)),
        grid=grid,
        in_specs=[
            pl.BlockSpec((COUT_PAD, K_PAD), lambda c, i: (0, 0)),
            pl.BlockSpec((K_PAD, tile_m), lambda c, i: (0, c * inner + i)),
            pl.BlockSpec((TGT_ROWS, tile_m), lambda c, i: (0, c * inner + i)),
        ],
        out_specs=(
            pl.BlockSpec((COUT_PAD, tile_m), lambda c, i: (0, c * inner + i)),
            pl.BlockSpec((1, TGT_ROWS, 1), lambda c, i: (c, 0, 0)),
        ),
        scratch_shapes=[pltpu.VMEM((TGT_ROWS, tile_m), jnp.float32)],
        compiler_params=pltpu.CompilerParams(
            dimension_semantics=("parallel", "arbitrary"),
            vmem_limit_bytes=32 * 1024 * 1024),
        cost_estimate=cost,
    )(w_mat, patchesT, tgtT)
    return slab, loss_rows


# ----------------------------------------------------------------------------
# Wrapper-side packing (im2col, weights, targets)
# ----------------------------------------------------------------------------
def _pack_weights(w, b):
    """w: [9, Cin, 3, 3] (PyTorch Conv2d layout), b: [9] ->
    wT [16, 32] bf16 in kernel channel order with bias folded in."""
    cout, cin = w.shape[0], w.shape[1]
    perm = jnp.asarray(KERNEL_PERM, jnp.int32)
    wk = jnp.take(w, perm, axis=0)                         # reorder Cout
    bk = jnp.take(b, perm, axis=0)
    wm = jnp.transpose(wk, (0, 2, 3, 1)).reshape(cout, 9 * cin)   # K=(kh,kw,cin)
    wm = jnp.concatenate([wm, bk[:, None]], axis=1)        # bias -> K row 27
    wm = jnp.pad(wm, ((0, COUT_PAD - cout), (0, K_PAD - (9 * cin + 1))))
    return wm.astype(jnp.bfloat16)


def _build_patchesT(x_nchw, m_pad):
    """Channel-major im2col (K on sublanes, pixels on lanes) + bias ones row.
    TODO(synk): move this into the kernel with a halo row-band DMA."""
    n, cin, h, w = x_nchw.shape
    m = n * h * w
    xp = jnp.pad(x_nchw, ((0, 0), (0, 0), (1, 1), (1, 1)))
    rows = [xp[:, ci, di:di + h, dj:dj + w].reshape(1, m)
            for di in range(3) for dj in range(3) for ci in range(cin)]
    rows.append(jnp.ones((1, m), x_nchw.dtype))            # bias lane
    p = jnp.concatenate(rows, axis=0).astype(jnp.bfloat16)  # [28, M]
    return jnp.pad(p, ((0, K_PAD - (9 * cin + 1)), (0, m_pad - m)))


def _build_targetsT(m_pad, m, gt_map, gt_seg, gt_seg_sec, gt_fore, gt_fore_sec):
    t = jnp.stack(
        [gt_map.reshape(m).astype(jnp.float32),
         gt_seg.reshape(m).astype(jnp.float32),
         gt_seg_sec.reshape(m).astype(jnp.float32),
         gt_fore.reshape(m).astype(jnp.float32),
         gt_fore_sec.reshape(m).astype(jnp.float32)],
        axis=0)                                             # [5, M]
    return jnp.pad(t, ((0, TGT_ROWS - 5), (0, m_pad - m)))


# ----------------------------------------------------------------------------
# CrowdCounter forward (train_mode=True branch of CC.forward / build_loss)
# ----------------------------------------------------------------------------
def init_params(key):
    # Stand-in CCN head: one 3x3 conv, 3 -> 9 channels (PyTorch channel order):
    #   ch 0   : density_map
    #   ch 1:3 : pred_seg        (2-class logits)
    #   ch 3:5 : pred_seg_sec
    #   ch 5:7 : pred_fore
    #   ch 7:9 : pred_fore_sec
    kw, kb = jax.random.split(key)
    w = jax.random.normal(kw, (9, 3, 3, 3), jnp.float32) * 0.1
    b = jax.random.normal(kb, (9,), jnp.float32) * 0.01
    return {"w": w, "b": b}


@functools.partial(jax.jit, static_argnames=("tile_m",))
def crowd_counter_forward(params, img, gt_map, gt_seg, gt_seg_sec,
                          gt_fore, gt_fore_sec, *, tile_m=2048):
    assert tile_m % 128 == 0
    n, _, h, w = img.shape
    m = n * h * w
    m_pad = _round_up(m, 2 * tile_m)

    w_mat = _pack_weights(params["w"], params["b"])
    patchesT = _build_patchesT(img, m_pad)
    tgtT = _build_targetsT(m_pad, m, gt_map, gt_seg, gt_seg_sec,
                           gt_fore, gt_fore_sec)

    slab, loss_rows = fused_conv_and_losses(
        w_mat, patchesT, tgtT, m_true=m, tile_m=tile_m)

    # Predictions back to PyTorch NCHW: one gather + one transpose total.
    feats = jnp.take(slab, jnp.asarray(PRED_PERM, jnp.int32), axis=0)[:, :m]
    chw = jnp.transpose(feats.reshape(9, n, h, w), (1, 0, 2, 3))   # [N,9,H,W]
    density_map   = chw[:, 0:1]
    pred_seg      = chw[:, 1:3]
    pred_seg_sec  = chw[:, 3:5]
    pred_fore     = chw[:, 5:7]
    pred_fore_sec = chw[:, 7:9]

    # Combine the per-core loss partial sums -> mean losses (build_loss).
    sums = (loss_rows[0, :, 0] + loss_rows[1, :, 0]) * (1.0 / m)
    losses = (sums[0], sums[1], sums[2], sums[3], sums[4])

    preds = (density_map, pred_seg, pred_seg_sec, pred_fore, pred_fore_sec)
    return preds, losses


if __name__ == "__main__":
    key = jax.random.PRNGKey(0)
    k_par, k_img, k_map, k1, k2, k3, k4 = jax.random.split(key, 7)

    N, Cin, H, W = 2, 3, 16, 16
    params = init_params(k_par)

    img         = jax.random.normal(k_img, (N, Cin, H, W), jnp.float32)
    gt_map      = jax.random.uniform(k_map, (N, 1, H, W), jnp.float32)
    gt_seg      = jax.random.randint(k1, (N, H, W), 0, 2, jnp.int32)
    gt_seg_sec  = jax.random.randint(k2, (N, H, W), 0, 2, jnp.int32)
    gt_fore     = jax.random.randint(k3, (N, H, W), 0, 2, jnp.int32)
    gt_fore_sec = jax.random.randint(k4, (N, H, W), 0, 2, jnp.int32)

    # tile_m=128 at demo size (M=512) so the grid has multiple inner steps.
    preds, losses = crowd_counter_forward(
        params, img, gt_map, gt_seg, gt_seg_sec, gt_fore, gt_fore_sec,
        tile_m=128)
    jax.block_until_ready(preds)
    jax.block_until_ready(losses)
    print("KERNEL_OK")
</pallas_src>

<mosaic_0001>
module attributes {stable_mosaic.version = 11 : i64} {
  func.func @_fused_conv_loss_kernel(%arg0: i32, %arg1: i32, %arg2: memref<16x32xbf16, #tpu.memory_space<vmem>>, %arg3: memref<32x128xbf16, #tpu.memory_space<vmem>>, %arg4: memref<8x128xf32, #tpu.memory_space<vmem>>, %arg5: memref<16x128xf32, #tpu.memory_space<vmem>>, %arg6: memref<1x8x1xf32, #tpu.memory_space<vmem>>, %arg7: memref<8x128xf32, #tpu.memory_space<vmem>>) attributes {dimension_semantics = [#tpu.dimension_semantics<parallel>, #tpu.dimension_semantics<arbitrary>], iteration_bounds = array<i64: 2, 2>, scalar_prefetch = 0 : i64, scratch_operands = 1 : i64, tpu.core_type = #tpu.core_type<tc>, window_params = [{pipeline_mode = #tpu.pipeline_mode<synchronous>, transform_indices = @transform_0, window_bounds = array<i64: 16, 32>}, {transform_indices = @transform_1, window_bounds = array<i64: 32, 128>}, {transform_indices = @transform_2, window_bounds = array<i64: 8, 128>}, {transform_indices = @transform_3, window_bounds = array<i64: 16, 128>}, {transform_indices = @transform_4, window_bounds = array<i64: 1, 8, 1>}]} {
    %c0_i32 = arith.constant 0 : i32
    %0 = arith.cmpi eq, %arg1, %c0_i32 : i32
    %1 = arith.extui %0 : i1 to i32
    %c0_i32_0 = arith.constant 0 : i32
    %2 = arith.cmpi ne, %1, %c0_i32_0 : i32
    scf.if %2 {
      %cst_18 = arith.constant 0.000000e+00 : f32
      %49 = vector.broadcast %cst_18 : f32 to vector<8x128xf32>
      %c0_19 = arith.constant 0 : index
      %c0_20 = arith.constant 0 : index
      %50 = vector.load %arg7[%c0_19, %c0_20] : memref<8x128xf32, #tpu.memory_space<vmem>>, vector<8x128xf32>
      tpu.vector_store %arg7[%c0_19, %c0_20], %49 {strides = array<i32>} : memref<8x128xf32, #tpu.memory_space<vmem>>, vector<8x128xf32>,
    } else {
    }
    %c0 = arith.constant 0 : index
    %c0_1 = arith.constant 0 : index
    %3 = vector.load %arg2[%c0, %c0_1] : memref<16x32xbf16, #tpu.memory_space<vmem>>, vector<16x32xbf16>
    %c0_2 = arith.constant 0 : index
    %c0_3 = arith.constant 0 : index
    %4 = vector.load %arg3[%c0_2, %c0_3] : memref<32x128xbf16, #tpu.memory_space<vmem>>, vector<32x128xbf16>
    %cst = arith.constant dense<0.000000e+00> : vector<16x128xf32>
    %5 = tpu.matmul %3, %4, %cst {dimension_numbers = #tpu.dot_dimension_numbers<[1], [0], [0], [1], [0, 0, 1, 1], [], []>} : vector<16x32xbf16>, vector<32x128xbf16>, vector<16x128xf32> -> vector<16x128xf32>
    %c0_4 = arith.constant 0 : index
    %c0_5 = arith.constant 0 : index
    %6 = vector.load %arg5[%c0_4, %c0_5] : memref<16x128xf32, #tpu.memory_space<vmem>>, vector<16x128xf32>
    tpu.vector_store %arg5[%c0_4, %c0_5], %5 {strides = array<i32>} : memref<16x128xf32, #tpu.memory_space<vmem>>, vector<16x128xf32>,
    %c0_6 = arith.constant 0 : index
    %c0_7 = arith.constant 0 : index
    %7 = vector.load %arg4[%c0_6, %c0_7] : memref<8x128xf32, #tpu.memory_space<vmem>>, vector<8x128xf32>
    %8 = tpu.iota {dimensions = array<i32: 1>} : vector<1x128xi32>
    %c2_i32 = arith.constant 2 : i32
    %9 = arith.muli %arg0, %c2_i32 : i32
    %10 = arith.addi %9, %arg1 : i32
    %c128_i32 = arith.constant 128 : i32
    %11 = arith.muli %10, %c128_i32 : i32
    %12 = vector.broadcast %11 : i32 to vector<1x128xi32>
    %13 = arith.addi %12, %8 : vector<1x128xi32>
    %c512_i32 = arith.constant 512 : i32
    %14 = vector.broadcast %c512_i32 : i32 to vector<1x128xi32>
    %15 = arith.cmpi slt, %13, %14 : vector<1x128xi32>
    %16 = arith.extui %15 : vector<1x128xi1> to vector<1x128xi32>
    %17 = arith.sitofp %16 : vector<1x128xi32> to vector<1x128xf32>
    %18 = vector.extract_strided_slice %5 {offsets = [0, 0], sizes = [1, 128], strides = [1, 1]} : vector<16x128xf32> to vector<1x128xf32>
    %19 = vector.extract_strided_slice %7 {offsets = [0, 0], sizes = [1, 128], strides = [1, 1]} : vector<8x128xf32> to vector<1x128xf32>
    %20 = arith.subf %18, %19 : vector<1x128xf32>
    %21 = arith.mulf %20, %17 : vector<1x128xf32>
    %c0_8 = arith.constant 0 : index
    %c0_9 = arith.constant 0 : index
    %22 = vector.load %arg7[%c0_8, %c0_9] : memref<8x128xf32, #tpu.memory_space<vmem>>, vector<1x128xf32>
    %23 = arith.mulf %21, %21 : vector<1x128xf32>
    %24 = arith.addf %22, %23 : vector<1x128xf32>
    %c0_10 = arith.constant 0 : index
    %c0_11 = arith.constant 0 : index
    %25 = vector.load %arg7[%c0_10, %c0_11] : memref<8x128xf32, #tpu.memory_space<vmem>>, vector<1x128xf32>
    tpu.vector_store %arg7[%c0_10, %c0_11], %24 {strides = array<i32>} : memref<8x128xf32, #tpu.memory_space<vmem>>, vector<1x128xf32>,
    %26 = vector.extract_strided_slice %5 {offsets = [1, 0], sizes = [4, 128], strides = [1, 1]} : vector<16x128xf32> to vector<4x128xf32>
    %27 = vector.extract_strided_slice %5 {offsets = [5, 0], sizes = [4, 128], strides = [1, 1]} : vector<16x128xf32> to vector<4x128xf32>
    %28 = vector.extract_strided_slice %7 {offsets = [1, 0], sizes = [4, 128], strides = [1, 1]} : vector<8x128xf32> to vector<4x128xf32>
    %29 = arith.maximumf %26, %27 : vector<4x128xf32>
    %30 = arith.subf %26, %27 : vector<4x128xf32>
    %31 = math.absf %30 : vector<4x128xf32>
    %cst_12 = arith.constant 0.000000e+00 : f32
    %32 = vector.broadcast %cst_12 : f32 to vector<4x128xf32>
    %33 = arith.subf %32, %31 : vector<4x128xf32>
    %34 = math.exp %33 : vector<4x128xf32>
    %35 = math.log1p %34 : vector<4x128xf32>
    %36 = arith.addf %29, %35 : vector<4x128xf32>
    %cst_13 = arith.constant 5.000000e-01 : f32
    %37 = vector.broadcast %cst_13 : f32 to vector<4x128xf32>
    %38 = arith.cmpf olt, %28, %37 : vector<4x128xf32>
    %39 = arith.select %38, %26, %27 : vector<4x128xi1>, vector<4x128xf32>
    %c1 = arith.constant 1 : index
    %c0_14 = arith.constant 0 : index
    %40 = vector.load %arg7[%c1, %c0_14] : memref<8x128xf32, #tpu.memory_space<vmem>>, vector<4x128xf32>
    %41 = arith.subf %36, %39 : vector<4x128xf32>
    %42 = vector.broadcast %17 : vector<1x128xf32> to vector<4x128xf32>
    %43 = arith.mulf %41, %42 : vector<4x128xf32>
    %44 = arith.addf %40, %43 : vector<4x128xf32>
    %c1_15 = arith.constant 1 : index
    %c0_16 = arith.constant 0 : index
    %45 = vector.load %arg7[%c1_15, %c0_16] : memref<8x128xf32, #tpu.memory_space<vmem>>, vector<4x128xf32>
    tpu.vector_store %arg7[%c1_15, %c0_16], %44 {strides = array<i32>} : memref<8x128xf32, #tpu.memory_space<vmem>>, vector<4x128xf32>,
    %c1_i32 = arith.constant 1 : i32
    %46 = arith.cmpi eq, %arg1, %c1_i32 : i32
    %47 = arith.extui %46 : i1 to i32
    %c0_i32_17 = arith.constant 0 : i32
    %48 = arith.cmpi ne, %47, %c0_i32_17 : i32
    scf.if %48 {
      %c0_18 = arith.constant 0 : index
      %c0_19 = arith.constant 0 : index
      %49 = vector.load %arg7[%c0_18, %c0_19] : memref<8x128xf32, #tpu.memory_space<vmem>>, vector<8x128xf32>
      %cst_20 = arith.constant dense<0.000000e+00> : vector<8xf32>
      %50 = vector.multi_reduction <add>, %49, %cst_20 [1] : vector<8x128xf32> to vector<8xf32>
      %51 = vector.shape_cast %50 : vector<8xf32> to vector<8x1xf32>
      %52 = vector.shape_cast %51 : vector<8x1xf32> to vector<1x8x1xf32>
      %c0_21 = arith.constant 0 : index
      %c0_22 = arith.constant 0 : index
      %c0_23 = arith.constant 0 : index
      %53 = vector.load %arg6[%c0_21, %c0_22, %c0_23] : memref<1x8x1xf32, #tpu.memory_space<vmem>>, vector<1x8x1xf32>
      tpu.vector_store %arg6[%c0_21, %c0_22, %c0_23], %52 {strides = array<i32>} : memref<1x8x1xf32, #tpu.memory_space<vmem>>, vector<1x8x1xf32>,
    } else {
    }
    return
  }
  func.func @transform_0(%arg0: i32, %arg1: i32) -> (i32, i32) {
    %c0_i32 = arith.constant 0 : i32
    %c0_i32_0 = arith.constant 0 : i32
    %c0_i32_1 = arith.constant 0 : i32
    return %c0_i32, %c0_i32_0 : i32, i32
  }
  func.func @transform_1(%arg0: i32, %arg1: i32) -> (i32, i32) {
    %c2_i32 = arith.constant 2 : i32
    %0 = arith.muli %arg0, %c2_i32 : i32
    %1 = arith.addi %0, %arg1 : i32
    %c0_i32 = arith.constant 0 : i32
    %c0_i32_0 = arith.constant 0 : i32
    return %c0_i32, %1 : i32, i32
  }
  func.func @transform_2(%arg0: i32, %arg1: i32) -> (i32, i32) {
    %c2_i32 = arith.constant 2 : i32
    %0 = arith.muli %arg0, %c2_i32 : i32
    %1 = arith.addi %0, %arg1 : i32
    %c0_i32 = arith.constant 0 : i32
    %c0_i32_0 = arith.constant 0 : i32
    return %c0_i32, %1 : i32, i32
  }
  func.func @transform_3(%arg0: i32, %arg1: i32) -> (i32, i32) {
    %c2_i32 = arith.constant 2 : i32
    %0 = arith.muli %arg0, %c2_i32 : i32
    %1 = arith.addi %0, %arg1 : i32
    %c0_i32 = arith.constant 0 : i32
    %c0_i32_0 = arith.constant 0 : i32
    return %c0_i32, %1 : i32, i32
  }
  func.func @transform_4(%arg0: i32, %arg1: i32) -> (i32, i32, i32) {
    %c0_i32 = arith.constant 0 : i32
    %c0_i32_0 = arith.constant 0 : i32
    %c0_i32_1 = arith.constant 0 : i32
    return %arg0, %c0_i32, %c0_i32_0 : i32, i32, i32
  }
}

</mosaic_0001>

<bundles_post_ra>
// kernel: squeeze.12
= control target key start
LH: loop header
LB: loop body
LE: loop exit
PB: predicated region body
PF: predicated region fallthrough
CT: control target
= control target key end

     0   :  { %s158_s10 = smov 80   ;;  %s159_s11 = smov 48   ;;  %vm63_vm0 = vcmask 130048   ;;  %vm69_vm1 = vcmask 1048448   ;;  %vm75_vm2 = vcmask 917248   ;;  %vm81_vm3 = vcmask 786048   ;;  %s192_s0 = inlined_call_operand.vmem [shape: bf16[2,1,16,16], index: 0, kind: input, shape index: {}]   ;;  %s193_s1 = inlined_call_operand.vmem [shape: bf16[1,512], index: 1, kind: output, shape index: {}]  }
   0x1   :  { %v149_v0 = vld [vmem:[%s192_s0 + $0x8] sm:$0xff]   ;;  %v146_v1 = vld [vmem:[%s192_s0] sm:$0xff]   ;;  %s157_s0 = smov 112   ;;  %s160_s12 = smov 96   ;;  %vm87_vm4 = vcmask 654848   ;;  %vm93_vm5 = vcmask 523648  }
   0x2   :  { %v143_v2 = vunpack.c.l.bf16 %v149_v0  ;;  %v144_v3 = vunpack.c.h.bf16 %v149_v0  ;;  %v148_v4 = vunpack.c.h.bf16 %v146_v1  ;;  %v147_v5 = vunpack.c.l.bf16 %v146_v1  ;;  %s161_s13 = smov 64   ;;  %s162_s14 = smov 32  }
   0x3   :  { %s163_s15 = smov 16   ;;  %vm99_vm6 = vcmask 392448   ;;  %vm105_vm7 = vcmask 261248  }
   0x4   :  { %18 = vst [vmem:[#allocation1 + $0x18] sm:$0xff] %v144_v3 }
   0x5   :  { %33 = vst [vmem:[#allocation1 + $0x10] sm:$0xff] %v143_v2 }
   0x6   :  { %48 = vst [vmem:[#allocation1 + $0x8] sm:$0xff] %v148_v4 }
   0x7   :  { %61 = vst [vmem:[#allocation1] sm:$0xff] %v147_v5 }
   0xe   :  { %v66_v6 = vld [vmem:[#allocation1 + $0x7] ss:$8 sm:$0xf]   ;;  %v78_v7 = vld [vmem:[#allocation1 + $0x5] ss:$8 sm:$0xf]  }
   0xf   :  { %67 = vrot.lane.b32.xlu0 %v66_v6, %s157_s0  ;;  %79 = vrot.lane.b32.xlu1 %v78_v7, %s158_s10  ;;  %v90_v8 = vld [vmem:[#allocation1 + $0x3] ss:$8 sm:$0xf]   ;;  %v72_v9 = vld [vmem:[#allocation1 + $0x6] ss:$8 sm:$0xf]  }
  0x10   :  { %91 = vrot.lane.b32.xlu2 %v90_v8, %s159_s11  ;;  %v84_v10 = vld [vmem:[#allocation1 + $0x4] ss:$8 sm:$0xf]   ;;  %v96_v11 = vld [vmem:[#allocation1 + $0x2] ss:$8 sm:$0xf]  }
  0x11   :  { %v102_v12 = vld [vmem:[#allocation1 + $0x1] ss:$8 sm:$0xf]   ;;  %v62_v13 = vld [vmem:[#allocation1] ss:$8 sm:$0xf]  }
  0x12   :  { %64 = vst.msk [vmem:[#allocation0] ss:$8 sm:$0xf] %vm63_vm0, %v62_v13  }
  0x17   :  { %73 = vrot.lane.b32.xlu0 %v72_v9, %s160_s12  ;;  %85 = vrot.lane.b32.xlu1 %v84_v10, %s161_s13 }
  0x18   :  { %97 = vrot.lane.b32.xlu2 %v96_v11, %s162_s14 }
  0x1f   :  { %103 = vrot.lane.b32.xlu0 %v102_v12, %s163_s15 }
  0x6a   :  { %v92_v14 = vpop.permute.xlu2 %91  }
  0x72   :  { %v98_v15 = vpop.permute.xlu2 %97  }
  0x81   :  { %v68_v16 = vpop.permute.xlu0 %67   ;;  %v80_v17 = vpop.permute.xlu1 %79  }
  0x82   :  { %70 = vst.msk [vmem:[#allocation0] ss:$8 sm:$0xf] %vm69_vm1, %v68_v16  }
  0x89   :  { %v74_v18 = vpop.permute.xlu0 %73   ;;  %v86_v19 = vpop.permute.xlu1 %85  }
  0x8a   :  { %76 = vst.msk [vmem:[#allocation0] ss:$8 sm:$0xf] %vm75_vm2, %v74_v18  }
  0x8b   :  { %82 = vst.msk [vmem:[#allocation0] ss:$8 sm:$0xf] %vm81_vm3, %v80_v17  }
  0x8c   :  { %88 = vst.msk [vmem:[#allocation0] ss:$8 sm:$0xf] %vm87_vm4, %v86_v19  }
  0x8d   :  { %94 = vst.msk [vmem:[#allocation0] ss:$8 sm:$0xf] %vm93_vm5, %v92_v14  }
  0x8e   :  { %100 = vst.msk [vmem:[#allocation0] ss:$8 sm:$0xf] %vm99_vm6, %v98_v15  }
  0x91   :  { %v104_v20 = vpop.permute.xlu0 %103  }
  0x92   :  { %106 = vst.msk [vmem:[#allocation0] ss:$8 sm:$0xf] %vm105_vm7, %v104_v20  }
  0x99   :  { %v109_v21 = vld [vmem:[#allocation0] sm:$0x3]  ;;  %v115_v22 = vld [vmem:[#allocation0 + $0x8] sm:$0x3]  ;;  %v122_v23 = vld [vmem:[#allocation0 + $0x10] sm:$0x3] }
  0x9a   :  { %v110_v24 = vpack.c.bf16 0.0, %v109_v21  ;;  %v116_v25 = vpack.c.bf16 0.0, %v115_v22  ;;  %v123_v26 = vpack.c.bf16 0.0, %v122_v23  ;;  %v129_v27 = vld [vmem:[#allocation0 + $0x18] sm:$0x3] }
  0x9b   :  { %v130_v28 = vpack.c.bf16 0.0, %v129_v27 }
  0x9c   :  { %113 = vst [vmem:[%s193_s1] sm:$0x1] %v110_v24 }
  0x9d   :  { %138 = vst [vmem:[%s193_s1 + $0x1] sm:$0x1] %v116_v25 }
  0x9e   :  { %139 = vst [vmem:[%s193_s1 + $0x2] sm:$0x1] %v123_v26 }
  0x9f   :  { %140 = vst [vmem:[%s193_s1 + $0x3] sm:$0x1] %v130_v28 }

// kernel: crowd_counter_forward.1
= control target key start
LH: loop header
LB: loop body
LE: loop exit
PB: predicated region body
PF: predicated region fallthrough
CT: control target
= control target key end

     0   :  { %s776_s15 = smov 0   ;;  %s778_s16 = smov 0   ;;  %s898_s0 = inlined_call_operand.vmem [shape: bf16[16,32], index: 0, kind: input, shape index: {}]   ;;  %s899_s1 = inlined_call_operand.vmem [shape: bf16[32,512], index: 1, kind: input, shape index: {}]   ;;  %s900_s2 = inlined_call_operand.vmem [shape: f32[8,512], index: 2, kind: input, shape index: {}]   ;;  %s901_s3 = inlined_call_operand.vmem [shape: f32[16,512], index: 3, kind: output, shape index: {0}]   ;;  %s902_s4 = inlined_call_operand.vmem [shape: f32[2,8,1], index: 4, kind: output, shape index: {1}]  }
   0x1   :  { %s780_s17 = smov 0   ;;  %s782_s18 = smov 0  }
   0x2   :  { %s784_s19 = smov 0   ;;  %s786_s20 = smov 0  }
   0x3   :  { %s788_s21 = smov 0  }
   0x4 LB: > { %s24_s22 = sadd.s32 1, %s739_s19  ;;  %s27_s23 = sadd.s32 1, %s743_s20  ;;  %s747_s21 = sphi %s788_s21, %s15_s21   ;;  %s743_s20 = sphi %s786_s20, %s909_s20   ;;  %s739_s19 = sphi %s784_s19, %s908_s19   ;;  %s735_s18 = sphi %s782_s18, %s907_s18   ;;  %s731_s17 = sphi %s780_s17, %s906_s17   ;;  %s727_s16 = sphi %s778_s16, %s905_s16   ;;  %s723_s15 = sphi %s776_s15, %s904_s15  }
   0x5   : > { %p25_p0 = scmp.ge.s32.totalorder %s24_s22, 2  ;;  %s586_s24 = sadd.s32 4294967295, %s747_s21  }
   0x6   : > { %s588_s25 = sshll.u32 %s743_s20, 1  ;;  %p66_p1 = scmp.ne.s32.totalorder %s727_s16, %s723_s15 }
   0x7   : > { %s911_s22 = smov (%p25_p0, %s24_s22), 0  ;;  %s913_s23 = smov (!%p25_p0, %s27_s23), %s743_s20 }
   0x8   : > { %p29_p2 = scmp.ge.s32.totalorder %s913_s23, 2  ;;  %p67_p3 = scmp.eq.s32.totalorder %s747_s21, 0 }
   0x9   : > { %s53_s26 = sadd.s32 %s739_s19, %s588_s25  ;;  %p130_p4 = scmp.eq.s32.totalorder %s586_s24, 3 }
   0xa   : > { %s915_s23 = smov (%p29_p2, %s913_s23), 0  ;;  %p68_p5 = por %p67_p3, %p66_p1 }
   0xb   : > { %p824_p6 = por %p130_p4, %p66_p1  ;;  %s589_s28 = sshll.u32 %s915_s23, 1 }
   0xc   : > { %s55_s29 = sadd.s32 %s589_s28, %s911_s22  ;;  %s59_s5 = sadd.s32 1, %s727_s16 }
   0xd   : > { %s56_s30 = ssub.s32 %s53_s26, %s55_s29  ;;  %p595_p8 = scmp.ge.s32.totalorder %s747_s21, 4 }
   0xe   : > { %p57_p7 = scmp.eq.s32.totalorder %s56_s30, 0 }
   0xf   : > { %181 = sbr.rel (%p595_p8) target bundleno = 28 (0x1c), region = 20 }
  0x10   : > { %s832_s6 = scalar_select %p57_p7, %s727_s16, %s59_s5  }
  0x14   : > { %184 = sbr.rel (!%p68_p5) target bundleno = 28 (0x1c), region = 24  ;;  %s186_s7 = sand.u32 (%p68_p5), 1, %s727_s16  }
  0x15   : > { %s598_s8 = sshll.u32 (%p68_p5), %s53_s26, 2  ;;  %s596_s9 = sshll.u32 (%p68_p5), %s186_s7, 4 }
  0x16   : > { %s192_s12 = scalar_lea.vmem (%p68_p5), %s899_s1, %s598_s8  ;;  %s188_s13 = scalar_lea.vmem (%p68_p5), [#allocation3], %s596_s9 }
  0x17   : > { %v209_v0 = vld [vmem:[%s192_s12] sm:$0xf] (%p68_p5)  ;;  %v211_v1 = vld [vmem:[%s192_s12 + $0x10] sm:$0xf] (%p68_p5) }
  0x18   : > { %210 = vst [vmem:[%s188_s13] sm:$0xf] (%p68_p5), %v209_v0  ;;  %v213_v2 = vld [vmem:[%s192_s12 + $0x20] sm:$0xf] (%p68_p5)  ;;  %v215_v3 = vld [vmem:[%s192_s12 + $0x30] sm:$0xf] (%p68_p5) }
  0x19   : > { %212 = vst [vmem:[%s188_s13 + $0x4] sm:$0xf] %v211_v1 }
  0x1a   : > { %214 = vst [vmem:[%s188_s13 + $0x8] sm:$0xf] %v213_v2 }
  0x1b   : > { %216 = vst [vmem:[%s188_s13 + $0xc] sm:$0xf] %v215_v3 }
  0x1c PF: > { %p599_p9 = scmp.ge.s32.totalorder %s747_s21, 1  ;;  %p258_p10 = scmp.lt.s32.totalorder %s747_s21, 5 }
  0x1e   : > { %p259_p11 = pnand %p599_p9, %p258_p10 }
  0x1f   : > { %s265_s14 = sand.u32 (!%p259_p11), 1, %s723_s15   ;;  %s602_s24 = sshll.u32 (!%p259_p11), %s735_s18, 1 }
  0x20   : > { %262 = sbr.rel (%p259_p11) target bundleno = 357 (0x165), region = 69  ;;  %s600_s25 = sshll.u32 (!%p259_p11), %s265_s14, 4 }
  0x21   : > { %s844_s26 = sadd.s32 (!%p259_p11), %s731_s17, %s602_s24  ;;  %p311_p13 = scmp.lt.s32.totalorder (!%p259_p11), %s735_s18, 1 }
  0x22   : > { %p303_p12 = scmp.lt.s32.totalorder (!%p259_p11), %s844_s26, 3  ;;  %s267_s11 = scalar_lea.vmem (!%p259_p11), [#allocation3], %s600_s25 }
  0x23   : > { %s858_s12 = scalar_lea.vmem (!%p259_p11), [#allocation4], %s600_s25  ;;  %p605_p0 = scmp.ne.s32.totalorder (!%p259_p11), %s731_s17, 0 }
  0x25   : > { %s304_s28 = scalar_select %p303_p12, %s844_s26, 3 }
  0x26   : > { %s917_s18 = smov (!%p311_p13, %s735_s18), 1  ;;  %319 = sbr.rel (%p605_p0) target bundleno = 45 (0x2d), region = 77 }
  0x27   : > { %s603_s29 = sshll.u32 %s304_s28, 3  ;;  %s604_s8 = sshll.u32 %s917_s18, 3 }
  0x28   : > { %s306_s7 = scalar_lea.vmem %s900_s2, %s603_s29  ;;  %s856_s15 = scalar_lea.vmem %s902_s4, %s604_s8 }
  0x2b   : > { %v749_v4 = vmov 0.0  }
  0x2c   : > { %320 = vst [vmem:[#allocation2] sm:$0xff] %v749_v4 }
  0x2d PF: > { %v630_v5 = vld [vmem:[%s267_s11 + $0x8] sm:$0xff]  ;;  %v629_v6 = vld [vmem:[%s267_s11] sm:$0xff]  ;;  %vm344_vm0 = vcmask 261120   ;;  %v365_v8 = vlaneseq  ;;  %s620_s14 = sshll.u32 %s844_s26, 7  ;;  %v750_v14 = vmov 0.0   ;;  %vm383_vm2 = vcmask 1043456  }
  0x2e   : > { %354 = vmatpush.bf16.msra.mxu0 %v630_v5  ;;  %v628_v7 = vld [vmem:[%s898_s0] sm:$0xff]  ;;  %v370_v10 = vstv %s620_s14  ;;  %p622_p1 = scmp.ne.s32.totalorder %s731_s17, 1 }
  0x2f   : > { %v366_v9 = vand.u32 127, %v365_v8  ;;  %v364_v12 = vld [vmem:[%s306_s7] sm:$0xff] }
  0x30   : > { %vm404_vm4 = vcmp.lt.f32.partialorder %v364_v12, 0.5 }
  0x31   : > { %v371_v11 = vadd.s32 %v370_v10, %v366_v9 }
  0x32   : > { %355 = vmatpush.bf16.msra.mxu0 %v629_v6 }
  0x33   : > { %vm372_vm1 = vcmp.lt.s32.totalorder %v371_v11, 512  ;;  %v377_v18 = vld [vmem:[#allocation2] sm:$0x1]  ;;  %v406_v43 = vld [vmem:[#allocation2 + $0x1] sm:$0xf] }
  0x34   : > { %v621_v15 = vsel %vm372_vm1, 1.0, %v750_v14 }
  0x35   : > { %618 = vmatmul.msk.bf16.vlgmr.msra.gmra.mxu0 %vm344_vm0, %v628_v7 }
  0xb2   : > { %v357_v13 = vpop.f32.mrf.mxu0 }
  0xb3   : > { %362 = vst [vmem:[%s858_s12] sm:$0xff] %v357_v13  ;;  %v375_v16 = vsub.f32 %v357_v13, %v364_v12  ;;  %v384_v22 = vrot.slane %v357_v13, 4 }
  0xb5   : > { %v376_v17 = vmul.f32 %v621_v15, %v375_v16 }
  0xb7   : > { %v378_v19 = vmul.f32 %v376_v17, %v376_v17 }
  0xb9   : > { %v379_v20 = vadd.f32 %v378_v19, %v377_v18 }
  0xba   : > { %v359_v21 = vpop.f32.mrf.mxu0 }
  0xbb   : > { %363 = vst [vmem:[%s858_s12 + $0x8] sm:$0xff] %v359_v21  ;;  %v385_v23 = vrot.slane %v359_v21, 4 }
  0xbc   : > { %380 = vst [vmem:[#allocation2] sm:$0x1] %v379_v20 }
  0xbd   : > { %v386_v24 = vsel %vm383_vm2, %v384_v22, %v385_v23 }
  0xbe   : > { %v389_v25 = vsub.f32 %v357_v13, %v386_v24  ;;  %v388_v37 = vmax.f32 %v357_v13, %v386_v24  ;;  %v405_v40 = vsel %vm404_vm4, %v357_v13, %v386_v24 }
  0xc0   : > { %v390_v26 = vand.u32 2147483647, %v389_v25 }
  0xc2   : > { %v391_v27 = vsub.f32 0.0, %v390_v26 }
  0xc4   : > { %v392_v28 = vmul.f32 1.442695, %v391_v27 }
  0xc6   : > { %689 = vpow2.f32 %v392_v28 }
  0xcc   : > { %v690_v29 = vpop.eup %689 }
  0xcd   : > { %v394_v30 = vadd.f32 1.0, %v690_v29  ;;  %v397_v31 = vmul.f32 -0.5, %v690_v29  ;;  %v400_v33 = vand.u32 2147483647, %v690_v29 }
  0xcf   : > { %691 = vlog2.f32 %v394_v30  ;;  %v398_v32 = vadd.f32 1.0, %v397_v31  ;;  %vm401_vm3 = vcmp.lt.f32.partialorder %v400_v33, 0.0004427343 }
  0xd1   : > { %v399_v36 = vmul.f32 %v690_v29, %v398_v32 }
  0xd5   : > { %v692_v34 = vpop.eup %691 }
  0xd6   : > { %v396_v35 = vmul.f32 0.6931472, %v692_v34 }
  0xd8   : > { %v402_v38 = vsel %vm401_vm3, %v399_v36, %v396_v35 }
  0xd9   : > { %v403_v39 = vadd.f32 %v402_v38, %v388_v37 }
  0xdb   : > { %v407_v41 = vsub.f32 %v403_v39, %v405_v40 }
  0xdd   : > { %v408_v42 = vmul.f32 %v621_v15, %v407_v41 }
  0xdf   : > { %v410_v44 = vrot.slane %v408_v42, 1  ;;  %417 = sbr.rel (%p622_p1) target bundleno = 352 (0x160), region = 81 }
  0xe1   : > { %v412_v45 = vadd.f32 %v410_v44, %v406_v43 }
  0xe3   : > { %413 = vst [vmem:[#allocation2 + $0x1] sm:$0xf] %v412_v45 }
  0xe4   : > { %vm421_vm5 = vcmask 7168  }
  0xea   : > { %v418_v46 = vld [vmem:[#allocation2] sm:$0xff] }
  0xeb   : > { %419 = vadd.xlane.f32.xlu0 %v418_v46 }
 0x15e   : > { %v420_v47 = vpop.xlane.xlu0 %419 }
 0x15f   : > { %422 = vst.msk [vmem:[%s856_s15] sm:$0xff] %vm421_vm5, %v420_v47 }
 0x160 PF: > { %433 = sbr.rel (!%p824_p6) target bundleno = 357 (0x165), region = 85  ;;  %s625_s24 = sshll.u32 (%p824_p6), %s844_s26, 3  ;;  %v468_v48 = vld [vmem:[%s858_s12] sm:$0xff] (%p824_p6)  ;;  %v470_v49 = vld [vmem:[%s858_s12 + $0x8] sm:$0xff] (%p824_p6) }
 0x161   : > { %s437_s17 = scalar_lea.vmem (%p824_p6), %s901_s3, %s625_s24 }
 0x162   : > { %469 = vst [vmem:[%s437_s17] sm:$0xff] (%p824_p6), %v468_v48 }
 0x163   : > { %471 = vst [vmem:[%s437_s17 + $0x20] sm:$0xff] (%p824_p6), %v470_v49 }
 0x165 PF: > { %s15_s21 = sadd.s32 1, %s747_s21   ;;  %s904_s15 = smov %s727_s16 }
 0x166   : > { %p12_p2 = scmp.ge.s32.totalorder %s15_s21, 6   ;;  %s905_s16 = smov %s832_s6 }
 0x167   : > { %s906_s17 = smov %s739_s19  ;;  %s907_s18 = smov %s743_s20 }
 0x168   : > { %s908_s19 = smov %s911_s22  ;;  %s909_s20 = smov %s915_s23 }
 0x169   :  { %14 = sbr.rel (!%p12_p2) target bundleno = 4 (0x4), region = 169 }

</bundles_post_ra>
